<compile_context>
chip_gen: v5e
topology: v5e:2x2
jax: 0.10.0
libtpu: 0.0.40
codegen_flags: <defaults>
</compile_context>

<pallas_src>
import functools

import jax
import jax.numpy as jnp
from jax.experimental import pallas as pl
from jax.experimental.pallas import tpu as pltpu

LANES = 128
ROW_ALIGN = 32          # legal sublane multiple for f32/bf16/int8/fp8 blocks
MAX_BLOCK_ROWS = 8192   # 8192 * 128 * 4 B = 4 MiB per f32 input block
                        # -> 2 inputs x 2 pipeline buffers = 16 MiB VMEM
VMEM_LIMIT_BYTES = 32 * 1024 * 1024   # covers 16 MiB of input buffers + headroom


def _bce_partial_kernel(x_ref, t_ref, out_ref, *, numel, mask_tail):
    """Per-block partial sums, kept as (8, 128) vreg accumulators.

    out_ref block = f32[1, 4, 8, 128]:
      [0] fold(pos)          [1] fold(neg)
      [2] fold(loss * pos)   [3] fold(loss * neg)
    """
    i = pl.program_id(0)
    block_rows, lanes = x_ref.shape

    def compute_and_store(x, t):
        pos = (t == 1.0).astype(jnp.float32)
        neg = (t == 0.0).astype(jnp.float32)
        # Numerically-stable BCE-with-logits (same formulation PyTorch uses):
        #   loss = max(x, 0) - x*t + log1p(exp(-|x|))
        loss = jnp.maximum(x, 0.0) - x * t + jnp.log1p(jnp.exp(-jnp.abs(x)))

        def fold(v):
            # (block_rows, 128) -> (8, 128): sum groups of 8 sublane rows.
            # Layout-preserving reshape + major-axis sum = pure VPU vector adds
            # (no XLU cross-lane reduction, no scalar RMW per step).
            return jnp.sum(v.reshape(block_rows // 8, 8, lanes), axis=0)

        out_ref[0, 0] = fold(pos)
        out_ref[0, 1] = fold(neg)
        out_ref[0, 2] = fold(loss * pos)
        out_ref[0, 3] = fold(loss * neg)

    if not mask_tail:
        # Grid covers exactly numel elements: no masking anywhere.
        compute_and_store(x_ref[...].astype(jnp.float32),
                          t_ref[...].astype(jnp.float32))
    else:
        last = pl.num_programs(0) - 1

        @pl.when(i != last)
        def _():
            # Bulk blocks: fully valid, run the unmasked fast path.
            compute_and_store(x_ref[...].astype(jnp.float32),
                              t_ref[...].astype(jnp.float32))

        @pl.when(i == last)
        def _():
            # Only the last block can contain padding / grid-overshoot data.
            x = x_ref[...].astype(jnp.float32)
            t = t_ref[...].astype(jnp.float32)
            full_rows = numel // lanes   # rows valid across all 128 lanes
            rem = numel % lanes          # valid lanes in the single ragged row
            row_ids = jax.lax.broadcasted_iota(jnp.int32, (block_rows, lanes), 0)
            grow = i * block_rows + row_ids
            valid = grow < full_rows
            if rem:
                lane_ids = jax.lax.broadcasted_iota(
                    jnp.int32, (block_rows, lanes), 1)
                valid = valid | ((grow == full_rows) & (lane_ids < rem))
            # Mask the operands once instead of masking pos/neg/loss three
            # times: t=0.5 -> pos=neg=0 for invalid positions (they vanish
            # from every weighted fold); x=0 keeps the loss finite so garbage
            # in the OOB region can never turn into NaN/Inf.
            x = jnp.where(valid, x, 0.0)
            t = jnp.where(valid, t, 0.5)
            compute_and_store(x, t)


def bce_loss(logits, target):
    """Pallas implementation of the BCE module's forward pass."""
    assert logits.shape == target.shape
    numel = int(logits.size)
    assert numel > 0

    # Keep native dtypes in HBM; the kernel casts to f32 on the fly, so
    # bf16 / int8 targets (where {0,1} is exact) halve / quarter that stream.
    flat_x = logits.reshape(-1)
    flat_t = target.reshape(-1)

    # Pad only for reshapeability: rows aligned to 32 so the block shape is
    # legal for every input dtype's minimum tile.  At most 32*128-1 elements;
    # pad values are irrelevant because the kernel masks index >= numel.
    rows_total = pl.cdiv(numel, LANES)
    rows_total = ((rows_total + ROW_ALIGN - 1) // ROW_ALIGN) * ROW_ALIGN
    padded = rows_total * LANES
    if padded != numel:
        flat_x = jnp.pad(flat_x, (0, padded - numel))
        flat_t = jnp.pad(flat_t, (0, padded - numel))

    # Block size: as large as VMEM allows, but capped at ~half the rows so
    # there are >= 2 grid steps for v7x megacore to shard across both TCs.
    if rows_total >= 2 * ROW_ALIGN:
        half_rows = (rows_total // 2 // ROW_ALIGN) * ROW_ALIGN
        block_rows = min(MAX_BLOCK_ROWS, half_rows)
    else:
        block_rows = rows_total
    n_blocks = pl.cdiv(rows_total, block_rows)
    # True iff the grid covers more elements than numel (array pad and/or a
    # partial last block); all such elements live in the LAST grid block.
    mask_tail = (n_blocks * block_rows * LANES) != numel

    x2 = flat_x.reshape(rows_total, LANES)
    t2 = flat_t.reshape(rows_total, LANES)

    partials = pl.pallas_call(
        functools.partial(_bce_partial_kernel, numel=numel, mask_tail=mask_tail),
        out_shape=jax.ShapeDtypeStruct((n_blocks, 4, 8, LANES), jnp.float32),
        grid_spec=pltpu.PrefetchScalarGridSpec(
            num_scalar_prefetch=0,
            grid=(n_blocks,),
            in_specs=[
                pl.BlockSpec((block_rows, LANES), lambda i: (i, 0)),
                pl.BlockSpec((block_rows, LANES), lambda i: (i, 0)),
            ],
            out_specs=pl.BlockSpec((1, 4, 8, LANES), lambda i: (i, 0, 0, 0)),
        ),
        compiler_params=pltpu.CompilerParams(
            # Each grid step writes its own partial slot -> fully independent,
            # so the axis is parallel (megacore shards it across both v7x TCs).
            dimension_semantics=("parallel",),
            # 8192-row f32 blocks double-buffered = 16 MiB; raise the scoped
            # VMEM limit so this is legal on v5e's 16 MiB default as well.
            vmem_limit_bytes=VMEM_LIMIT_BYTES,
        ),
    )(x2, t2)

    # O(n_blocks * 16 KiB) finalize in plain JAX: one cross-lane reduction plus
    # the class-balance weighting -- negligible next to the HBM-bound main pass.
    sums = jnp.sum(partials, axis=(0, 2, 3))   # [num_pos, num_neg, pos_loss, neg_loss]
    num_pos, num_neg = sums[0], sums[1]
    num_total = num_pos + num_neg              # NOTE: 0 -> NaN, same as reference.
    alpha = num_neg / num_total
    beta = 1.1 * num_pos / num_total
    # F.binary_cross_entropy_with_logits(..., weight, reduction='mean') divides
    # by the element count, not by the weight sum.
    return (alpha * sums[2] + beta * sums[3]) / numel


def bce_ref(logits, target):
    """Pure-JAX reference mirroring the PyTorch module exactly."""
    x = logits.astype(jnp.float32)
    t = target.astype(jnp.float32)
    pos = (t == 1.0).astype(jnp.float32)
    neg = (t == 0.0).astype(jnp.float32)
    num_pos = jnp.sum(pos)
    num_neg = jnp.sum(neg)
    num_total = num_pos + num_neg
    alpha = num_neg / num_total
    beta = 1.1 * num_pos / num_total
    weights = alpha * pos + beta * neg
    loss = jnp.maximum(x, 0.0) - x * t + jnp.log1p(jnp.exp(-jnp.abs(x)))
    return jnp.sum(weights * loss) / x.size


if __name__ == "__main__":
    key = jax.random.PRNGKey(0)
    k_in, k_tgt = jax.random.split(key)

    # Primary small NCHW case consistent with a segmentation-style BCE loss.
    shape = (2, 4, 16, 16)
    logits = jax.random.normal(k_in, shape, dtype=jnp.float32)
    target = jax.random.bernoulli(k_tgt, 0.3, shape).astype(jnp.float32)

    out = jax.block_until_ready(bce_loss(logits, target))
    ref = bce_ref(logits, target)
    assert jnp.allclose(out, ref, rtol=1e-5, atol=1e-6), (out, ref)

    # Multi-block exact-fit path and the ragged / gated-tail-mask path.
    for extra_shape in [(4, 8, 128, 128), (2, 3, 37, 53)]:
        ka, kb = jax.random.split(jax.random.PRNGKey(1))
        xl = jax.random.normal(ka, extra_shape, dtype=jnp.float32)
        tg = jax.random.bernoulli(kb, 0.3, extra_shape).astype(jnp.float32)
        o = jax.block_until_ready(bce_loss(xl, tg))
        r = bce_ref(xl, tg)
        assert jnp.allclose(o, r, rtol=1e-4, atol=1e-6), (extra_shape, o, r)

    # Narrow-dtype path: bf16 logits + bf16 targets stay narrow in HBM
    # ({0,1} is exact in bf16); kernel casts to f32 internally.
    xb = jax.random.normal(k_in, shape, dtype=jnp.bfloat16)
    tb = jax.random.bernoulli(k_tgt, 0.3, shape).astype(jnp.bfloat16)
    ob = jax.block_until_ready(bce_loss(xb, tb))
    rb = bce_ref(xb, tb)
    assert jnp.allclose(ob, rb, rtol=1e-3, atol=1e-5), (ob, rb)

    print("KERNEL_OK")
</pallas_src>

<mosaic_0001>
module attributes {stable_mosaic.version = 11 : i64} {
  func.func @_bce_partial_kernel(%arg0: i32, %arg1: memref<32x128xf32, #tpu.memory_space<vmem>>, %arg2: memref<32x128xf32, #tpu.memory_space<vmem>>, %arg3: memref<1x4x8x128xf32, #tpu.memory_space<vmem>>) attributes {dimension_semantics = [#tpu.dimension_semantics<parallel>], iteration_bounds = array<i64: 1>, scalar_prefetch = 0 : i64, scratch_operands = 0 : i64, tpu.core_type = #tpu.core_type<tc>, window_params = [{transform_indices = @transform_0, window_bounds = array<i64: 32, 128>}, {transform_indices = @transform_1, window_bounds = array<i64: 32, 128>}, {transform_indices = @transform_2, window_bounds = array<i64: 1, 4, 8, 128>}]} {
    %c0_i32 = arith.constant 0 : i32
    %0 = arith.cmpi ne, %arg0, %c0_i32 : i32
    %1 = arith.extui %0 : i1 to i32
    %c0_i32_0 = arith.constant 0 : i32
    %2 = arith.cmpi ne, %1, %c0_i32_0 : i32
    scf.if %2 {
      %c0 = arith.constant 0 : index
      %c0_3 = arith.constant 0 : index
      %6 = vector.load %arg1[%c0, %c0_3] : memref<32x128xf32, #tpu.memory_space<vmem>>, vector<32x128xf32>
      %c0_4 = arith.constant 0 : index
      %c0_5 = arith.constant 0 : index
      %7 = vector.load %arg2[%c0_4, %c0_5] : memref<32x128xf32, #tpu.memory_space<vmem>>, vector<32x128xf32>
      %cst = arith.constant 1.000000e+00 : f32
      %8 = vector.broadcast %cst : f32 to vector<32x128xf32>
      %9 = arith.cmpf oeq, %7, %8 : vector<32x128xf32>
      %10 = arith.extui %9 : vector<32x128xi1> to vector<32x128xi32>
      %11 = arith.sitofp %10 : vector<32x128xi32> to vector<32x128xf32>
      %cst_6 = arith.constant 0.000000e+00 : f32
      %12 = vector.broadcast %cst_6 : f32 to vector<32x128xf32>
      %13 = arith.cmpf oeq, %7, %12 : vector<32x128xf32>
      %14 = arith.extui %13 : vector<32x128xi1> to vector<32x128xi32>
      %15 = arith.sitofp %14 : vector<32x128xi32> to vector<32x128xf32>
      %cst_7 = arith.constant 0.000000e+00 : f32
      %16 = vector.broadcast %cst_7 : f32 to vector<32x128xf32>
      %17 = arith.maximumf %6, %16 : vector<32x128xf32>
      %18 = arith.mulf %6, %7 : vector<32x128xf32>
      %19 = arith.subf %17, %18 : vector<32x128xf32>
      %20 = math.absf %6 : vector<32x128xf32>
      %cst_8 = arith.constant 0.000000e+00 : f32
      %21 = vector.broadcast %cst_8 : f32 to vector<32x128xf32>
      %22 = arith.subf %21, %20 : vector<32x128xf32>
      %23 = math.exp %22 : vector<32x128xf32>
      %24 = math.log1p %23 : vector<32x128xf32>
      %25 = arith.addf %19, %24 : vector<32x128xf32>
      %26 = vector.shape_cast %11 : vector<32x128xf32> to vector<4x8x128xf32>
      %cst_9 = arith.constant dense<0.000000e+00> : vector<8x128xf32>
      %27 = vector.multi_reduction <add>, %26, %cst_9 [0] : vector<4x8x128xf32> to vector<8x128xf32>
      %c0_10 = arith.constant 0 : index
      %c0_11 = arith.constant 0 : index
      %c0_12 = arith.constant 0 : index
      %c0_13 = arith.constant 0 : index
      %28 = vector.load %arg3[%c0_10, %c0_11, %c0_12, %c0_13] : memref<1x4x8x128xf32, #tpu.memory_space<vmem>>, vector<1x1x8x128xf32>
      %29 = vector.shape_cast %28 : vector<1x1x8x128xf32> to vector<8x128xf32>
      %30 = vector.shape_cast %27 : vector<8x128xf32> to vector<1x1x8x128xf32>
      tpu.vector_store %arg3[%c0_10, %c0_11, %c0_12, %c0_13], %30 {strides = array<i32>} : memref<1x4x8x128xf32, #tpu.memory_space<vmem>>, vector<1x1x8x128xf32>,
      %31 = vector.shape_cast %15 : vector<32x128xf32> to vector<4x8x128xf32>
      %cst_14 = arith.constant dense<0.000000e+00> : vector<8x128xf32>
      %32 = vector.multi_reduction <add>, %31, %cst_14 [0] : vector<4x8x128xf32> to vector<8x128xf32>
      %c0_15 = arith.constant 0 : index
      %c1 = arith.constant 1 : index
      %c0_16 = arith.constant 0 : index
      %c0_17 = arith.constant 0 : index
      %33 = vector.load %arg3[%c0_15, %c1, %c0_16, %c0_17] : memref<1x4x8x128xf32, #tpu.memory_space<vmem>>, vector<1x1x8x128xf32>
      %34 = vector.shape_cast %33 : vector<1x1x8x128xf32> to vector<8x128xf32>
      %35 = vector.shape_cast %32 : vector<8x128xf32> to vector<1x1x8x128xf32>
      tpu.vector_store %arg3[%c0_15, %c1, %c0_16, %c0_17], %35 {strides = array<i32>} : memref<1x4x8x128xf32, #tpu.memory_space<vmem>>, vector<1x1x8x128xf32>,
      %36 = arith.mulf %25, %11 : vector<32x128xf32>
      %37 = vector.shape_cast %36 : vector<32x128xf32> to vector<4x8x128xf32>
      %cst_18 = arith.constant dense<0.000000e+00> : vector<8x128xf32>
      %38 = vector.multi_reduction <add>, %37, %cst_18 [0] : vector<4x8x128xf32> to vector<8x128xf32>
      %c0_19 = arith.constant 0 : index
      %c2 = arith.constant 2 : index
      %c0_20 = arith.constant 0 : index
      %c0_21 = arith.constant 0 : index
      %39 = vector.load %arg3[%c0_19, %c2, %c0_20, %c0_21] : memref<1x4x8x128xf32, #tpu.memory_space<vmem>>, vector<1x1x8x128xf32>
      %40 = vector.shape_cast %39 : vector<1x1x8x128xf32> to vector<8x128xf32>
      %41 = vector.shape_cast %38 : vector<8x128xf32> to vector<1x1x8x128xf32>
      tpu.vector_store %arg3[%c0_19, %c2, %c0_20, %c0_21], %41 {strides = array<i32>} : memref<1x4x8x128xf32, #tpu.memory_space<vmem>>, vector<1x1x8x128xf32>,
      %42 = arith.mulf %25, %15 : vector<32x128xf32>
      %43 = vector.shape_cast %42 : vector<32x128xf32> to vector<4x8x128xf32>
      %cst_22 = arith.constant dense<0.000000e+00> : vector<8x128xf32>
      %44 = vector.multi_reduction <add>, %43, %cst_22 [0] : vector<4x8x128xf32> to vector<8x128xf32>
      %c0_23 = arith.constant 0 : index
      %c3 = arith.constant 3 : index
      %c0_24 = arith.constant 0 : index
      %c0_25 = arith.constant 0 : index
      %45 = vector.load %arg3[%c0_23, %c3, %c0_24, %c0_25] : memref<1x4x8x128xf32, #tpu.memory_space<vmem>>, vector<1x1x8x128xf32>
      %46 = vector.shape_cast %45 : vector<1x1x8x128xf32> to vector<8x128xf32>
      %47 = vector.shape_cast %44 : vector<8x128xf32> to vector<1x1x8x128xf32>
      tpu.vector_store %arg3[%c0_23, %c3, %c0_24, %c0_25], %47 {strides = array<i32>} : memref<1x4x8x128xf32, #tpu.memory_space<vmem>>, vector<1x1x8x128xf32>,
    } else {
    }
    %c0_i32_1 = arith.constant 0 : i32
    %3 = arith.cmpi eq, %arg0, %c0_i32_1 : i32
    %4 = arith.extui %3 : i1 to i32
    %c0_i32_2 = arith.constant 0 : i32
    %5 = arith.cmpi ne, %4, %c0_i32_2 : i32
    scf.if %5 {
      %c0 = arith.constant 0 : index
      %c0_3 = arith.constant 0 : index
      %6 = vector.load %arg1[%c0, %c0_3] : memref<32x128xf32, #tpu.memory_space<vmem>>, vector<32x128xf32>
      %c0_4 = arith.constant 0 : index
      %c0_5 = arith.constant 0 : index
      %7 = vector.load %arg2[%c0_4, %c0_5] : memref<32x128xf32, #tpu.memory_space<vmem>>, vector<32x128xf32>
      %8 = tpu.iota {dimensions = array<i32: 0>} : vector<32x128xi32>
      %c32_i32 = arith.constant 32 : i32
      %9 = arith.muli %arg0, %c32_i32 : i32
      %10 = vector.broadcast %9 : i32 to vector<32x128xi32>
      %11 = arith.addi %10, %8 : vector<32x128xi32>
      %c16_i32 = arith.constant 16 : i32
      %12 = vector.broadcast %c16_i32 : i32 to vector<32x128xi32>
      %13 = arith.cmpi slt, %11, %12 : vector<32x128xi32>
      %cst = arith.constant 0.000000e+00 : f32
      %14 = vector.broadcast %cst : f32 to vector<32x128xf32>
      %15 = arith.select %13, %6, %14 : vector<32x128xi1>, vector<32x128xf32>
      %cst_6 = arith.constant 5.000000e-01 : f32
      %16 = vector.broadcast %cst_6 : f32 to vector<32x128xf32>
      %17 = arith.select %13, %7, %16 : vector<32x128xi1>, vector<32x128xf32>
      %cst_7 = arith.constant 1.000000e+00 : f32
      %18 = vector.broadcast %cst_7 : f32 to vector<32x128xf32>
      %19 = arith.cmpf oeq, %17, %18 : vector<32x128xf32>
      %20 = arith.extui %19 : vector<32x128xi1> to vector<32x128xi32>
      %21 = arith.sitofp %20 : vector<32x128xi32> to vector<32x128xf32>
      %cst_8 = arith.constant 0.000000e+00 : f32
      %22 = vector.broadcast %cst_8 : f32 to vector<32x128xf32>
      %23 = arith.cmpf oeq, %17, %22 : vector<32x128xf32>
      %24 = arith.extui %23 : vector<32x128xi1> to vector<32x128xi32>
      %25 = arith.sitofp %24 : vector<32x128xi32> to vector<32x128xf32>
      %cst_9 = arith.constant 0.000000e+00 : f32
      %26 = vector.broadcast %cst_9 : f32 to vector<32x128xf32>
      %27 = arith.maximumf %15, %26 : vector<32x128xf32>
      %28 = arith.mulf %15, %17 : vector<32x128xf32>
      %29 = arith.subf %27, %28 : vector<32x128xf32>
      %30 = math.absf %15 : vector<32x128xf32>
      %cst_10 = arith.constant 0.000000e+00 : f32
      %31 = vector.broadcast %cst_10 : f32 to vector<32x128xf32>
      %32 = arith.subf %31, %30 : vector<32x128xf32>
      %33 = math.exp %32 : vector<32x128xf32>
      %34 = math.log1p %33 : vector<32x128xf32>
      %35 = arith.addf %29, %34 : vector<32x128xf32>
      %36 = vector.shape_cast %21 : vector<32x128xf32> to vector<4x8x128xf32>
      %cst_11 = arith.constant dense<0.000000e+00> : vector<8x128xf32>
      %37 = vector.multi_reduction <add>, %36, %cst_11 [0] : vector<4x8x128xf32> to vector<8x128xf32>
      %c0_12 = arith.constant 0 : index
      %c0_13 = arith.constant 0 : index
      %c0_14 = arith.constant 0 : index
      %c0_15 = arith.constant 0 : index
      %38 = vector.load %arg3[%c0_12, %c0_13, %c0_14, %c0_15] : memref<1x4x8x128xf32, #tpu.memory_space<vmem>>, vector<1x1x8x128xf32>
      %39 = vector.shape_cast %38 : vector<1x1x8x128xf32> to vector<8x128xf32>
      %40 = vector.shape_cast %37 : vector<8x128xf32> to vector<1x1x8x128xf32>
      tpu.vector_store %arg3[%c0_12, %c0_13, %c0_14, %c0_15], %40 {strides = array<i32>} : memref<1x4x8x128xf32, #tpu.memory_space<vmem>>, vector<1x1x8x128xf32>,
      %41 = vector.shape_cast %25 : vector<32x128xf32> to vector<4x8x128xf32>
      %cst_16 = arith.constant dense<0.000000e+00> : vector<8x128xf32>
      %42 = vector.multi_reduction <add>, %41, %cst_16 [0] : vector<4x8x128xf32> to vector<8x128xf32>
      %c0_17 = arith.constant 0 : index
      %c1 = arith.constant 1 : index
      %c0_18 = arith.constant 0 : index
      %c0_19 = arith.constant 0 : index
      %43 = vector.load %arg3[%c0_17, %c1, %c0_18, %c0_19] : memref<1x4x8x128xf32, #tpu.memory_space<vmem>>, vector<1x1x8x128xf32>
      %44 = vector.shape_cast %43 : vector<1x1x8x128xf32> to vector<8x128xf32>
      %45 = vector.shape_cast %42 : vector<8x128xf32> to vector<1x1x8x128xf32>
      tpu.vector_store %arg3[%c0_17, %c1, %c0_18, %c0_19], %45 {strides = array<i32>} : memref<1x4x8x128xf32, #tpu.memory_space<vmem>>, vector<1x1x8x128xf32>,
      %46 = arith.mulf %35, %21 : vector<32x128xf32>
      %47 = vector.shape_cast %46 : vector<32x128xf32> to vector<4x8x128xf32>
      %cst_20 = arith.constant dense<0.000000e+00> : vector<8x128xf32>
      %48 = vector.multi_reduction <add>, %47, %cst_20 [0] : vector<4x8x128xf32> to vector<8x128xf32>
      %c0_21 = arith.constant 0 : index
      %c2 = arith.constant 2 : index
      %c0_22 = arith.constant 0 : index
      %c0_23 = arith.constant 0 : index
      %49 = vector.load %arg3[%c0_21, %c2, %c0_22, %c0_23] : memref<1x4x8x128xf32, #tpu.memory_space<vmem>>, vector<1x1x8x128xf32>
      %50 = vector.shape_cast %49 : vector<1x1x8x128xf32> to vector<8x128xf32>
      %51 = vector.shape_cast %48 : vector<8x128xf32> to vector<1x1x8x128xf32>
      tpu.vector_store %arg3[%c0_21, %c2, %c0_22, %c0_23], %51 {strides = array<i32>} : memref<1x4x8x128xf32, #tpu.memory_space<vmem>>, vector<1x1x8x128xf32>,
      %52 = arith.mulf %35, %25 : vector<32x128xf32>
      %53 = vector.shape_cast %52 : vector<32x128xf32> to vector<4x8x128xf32>
      %cst_24 = arith.constant dense<0.000000e+00> : vector<8x128xf32>
      %54 = vector.multi_reduction <add>, %53, %cst_24 [0] : vector<4x8x128xf32> to vector<8x128xf32>
      %c0_25 = arith.constant 0 : index
      %c3 = arith.constant 3 : index
      %c0_26 = arith.constant 0 : index
      %c0_27 = arith.constant 0 : index
      %55 = vector.load %arg3[%c0_25, %c3, %c0_26, %c0_27] : memref<1x4x8x128xf32, #tpu.memory_space<vmem>>, vector<1x1x8x128xf32>
      %56 = vector.shape_cast %55 : vector<1x1x8x128xf32> to vector<8x128xf32>
      %57 = vector.shape_cast %54 : vector<8x128xf32> to vector<1x1x8x128xf32>
      tpu.vector_store %arg3[%c0_25, %c3, %c0_26, %c0_27], %57 {strides = array<i32>} : memref<1x4x8x128xf32, #tpu.memory_space<vmem>>, vector<1x1x8x128xf32>,
    } else {
    }
    return
  }
  func.func @transform_0(%arg0: i32) -> (i32, i32) {
    %c0_i32 = arith.constant 0 : i32
    %c0_i32_0 = arith.constant 0 : i32
    return %arg0, %c0_i32 : i32, i32
  }
  func.func @transform_1(%arg0: i32) -> (i32, i32) {
    %c0_i32 = arith.constant 0 : i32
    %c0_i32_0 = arith.constant 0 : i32
    return %arg0, %c0_i32 : i32, i32
  }
  func.func @transform_2(%arg0: i32) -> (i32, i32, i32, i32) {
    %c0_i32 = arith.constant 0 : i32
    %c0_i32_0 = arith.constant 0 : i32
    %c0_i32_1 = arith.constant 0 : i32
    %c0_i32_2 = arith.constant 0 : i32
    return %arg0, %c0_i32, %c0_i32_0, %c0_i32_1 : i32, i32, i32, i32
  }
}

</mosaic_0001>

<bundles_post_ra>
// kernel: tpu_custom_call.1
= control target key start
LH: loop header
LB: loop body
LE: loop exit
PB: predicated region body
PF: predicated region fallthrough
CT: control target
= control target key end

     0   :  { %7 = vsyncpa [#allocation3], 0  ;;  %s496_s0 = inlined_call_operand.hbm [shape: f32[32,128], index: 0, kind: input, shape index: {}]   ;;  %s497_s1 = inlined_call_operand.hbm [shape: f32[32,128], index: 1, kind: input, shape index: {}]   ;;  %s498_s2 = inlined_call_operand.hbm [shape: f32[1,4,8,128], index: 2, kind: output, shape index: {}]  }
   0x1   :  { %8 = vsyncpa [#allocation6], 0 }
   0x2   :  { %9 = vsyncpa [#allocation4], 0  ;;  %s14_s11 = sshll.u32 %s496_s0, 4  ;;  %s457_s12 = smov [#allocation2]   ;;  %s15_s11 = int_to_ptr.hbm [resolvable:$true] %s14_s11 }
   0x3   :  { %s16_s13 = sshll.u32 %s457_s12, 4  ;;  %s27_s16 = sshll.u32 %s497_s1, 4  ;;  %s17_s13 = int_to_ptr.vmem [resolvable:$true] %s16_s13  ;;  %s28_s16 = int_to_ptr.hbm [resolvable:$true] %s27_s16 }
   0x4   :  { %s458_s17 = smov 128   ;;  %s459_s18 = smov 8  }
   0x5   :  { %22 = dma.hbm_to_vmem [thread:$0]  %s15_s11, 512, %s17_s13, [#allocation3], %s458_s17, %s458_s17, %s459_s18  }
   0x6   :  { %s460_s19 = smov [#allocation5]  }
   0x7   :  { %s29_s20 = sshll.u32 %s460_s19, 4  ;;  %s30_s20 = int_to_ptr.vmem [resolvable:$true] %s29_s20 }
   0x8   :  { %35 = dma.hbm_to_vmem [thread:$0]  %s28_s16, 512, %s30_s20, [#allocation6], %s458_s17, %s458_s17, %s459_s18  }
   0x9   :  { %451 = dma.done.wait [#allocation3], 512  }
   0xa   :  { %452 = vsyncadd [#allocation3], 4294966784 }
   0xb   :  { %453 = dma.done.wait [#allocation6], 512  }
   0xc   :  { %454 = vsyncadd [#allocation6], 4294966784  ;;  %v179_v0 = vld [vmem:[#allocation2] sm:$0xff]  ;;  %v180_v1 = vld [vmem:[#allocation2 + $0x8] sm:$0xff]  ;;  %v461_v4 = vmov 0.0   ;;  %s462_s0 = smov [#allocation7]  }
   0xd   :  { %v183_v2 = vld [vmem:[#allocation5] sm:$0xff]  ;;  %v184_v3 = vld [vmem:[#allocation5 + $0x8] sm:$0xff]  ;;  %367 = vpow2.f32 %v461_v4  ;;  %v246_v5 = vand.u32 2147483647, %v179_v0  ;;  %v247_v8 = vand.u32 2147483647, %v180_v1 }
   0xe   :  { %vm210_vm0 = vcmp.eq.f32.partialorder %v183_v2, 1.0  ;;  %vm211_vm1 = vcmp.eq.f32.partialorder %v184_v3, 1.0  ;;  %vm222_vm2 = vcmp.eq.f32.partialorder %v183_v2, 0.0  ;;  %vm223_vm3 = vcmp.eq.f32.partialorder %v184_v3, 0.0  ;;  %s333_s1 = sshll.u32 %s462_s0, 4  ;;  %s335_s23 = sshll.u32 %s498_s2, 4  ;;  %s334_s1 = int_to_ptr.vmem [resolvable:$true] %s333_s1  ;;  %s336_s23 = int_to_ptr.hbm [resolvable:$true] %s335_s23 }
   0xf   :  { %v357_v6 = vsel %vm210_vm0, 1.0, %v461_v4  ;;  %v358_v7 = vsel %vm211_vm1, 1.0, %v461_v4  ;;  %v250_v9 = vsub.f32 0.0, %v246_v5  ;;  %v251_v11 = vsub.f32 0.0, %v247_v8 }
  0x10   :  { %v302_v10 = vadd.f32 %v358_v7, %v357_v6  ;;  %v359_v12 = vsel %vm222_vm2, 1.0, %v461_v4  ;;  %v360_v13 = vsel %vm223_vm3, 1.0, %v461_v4  ;;  %v234_v26 = vmax.f32 %v179_v0, 0.0 }
  0x11   :  { %v254_v14 = vmul.f32 1.442695, %v250_v9  ;;  %v306_v15 = vadd.f32 %v360_v13, %v359_v12  ;;  %v256_v17 = vmul.f32 1.442695, %v251_v11  ;;  %v238_v27 = vmul.f32 %v183_v2, %v179_v0 }
  0x12   :  { %305 = vst [vmem:[#allocation7] sm:$0xff] %v302_v10  ;;  %v235_v33 = vmax.f32 %v180_v1, 0.0  ;;  %v239_v34 = vmul.f32 %v184_v3, %v180_v1 }
  0x13   :  { %v368_v16 = vpop.eup %367  ;;  %369 = vpow2.f32 %v254_v14  ;;  %310 = vst [vmem:[#allocation7 + $0x8] sm:$0xff] %v306_v15  ;;  %v242_v37 = vsub.f32 %v234_v26, %v238_v27 }
  0x14   :  { %371 = vpow2.f32 %v256_v17  ;;  %v280_v18 = vadd.f32 1.0, %v368_v16  ;;  %v283_v23 = vmul.f32 -0.5, %v368_v16  ;;  %v286_v36 = vand.u32 2147483647, %v368_v16 }
  0x15   :  { %v243_v44 = vsub.f32 %v235_v33, %v239_v34 }
  0x16   :  { %373 = vlog2.f32 %v280_v18  ;;  %v284_v31 = vadd.f32 1.0, %v283_v23  ;;  %vm287_vm6 = vcmp.lt.f32.partialorder %v286_v36, 0.0004427343 }
  0x18   :  { %v285_v42 = vmul.f32 %v368_v16, %v284_v31 }
  0x19   :  { %v370_v19 = vpop.eup %369 }
  0x1a   :  { %v372_v20 = vpop.eup %371  ;;  %v262_v21 = vadd.f32 1.0, %v370_v19  ;;  %v265_v22 = vmul.f32 -0.5, %v370_v19  ;;  %v268_v29 = vand.u32 2147483647, %v370_v19 }
  0x1b   :  { %v271_v24 = vadd.f32 1.0, %v372_v20  ;;  %v274_v25 = vmul.f32 -0.5, %v372_v20  ;;  %v277_v35 = vand.u32 2147483647, %v372_v20 }
  0x1c   :  { %375 = vlog2.f32 %v262_v21  ;;  %v266_v28 = vadd.f32 1.0, %v265_v22  ;;  %v374_v32 = vpop.eup %373  ;;  %vm269_vm4 = vcmp.lt.f32.partialorder %v268_v29, 0.0004427343 }
  0x1d   :  { %377 = vlog2.f32 %v271_v24  ;;  %v275_v30 = vadd.f32 1.0, %v274_v25  ;;  %v282_v41 = vmul.f32 0.6931472, %v374_v32  ;;  %vm278_vm5 = vcmp.lt.f32.partialorder %v277_v35, 0.0004427343 }
  0x1e   :  { %v267_v38 = vmul.f32 %v370_v19, %v266_v28 }
  0x1f   :  { %v276_v40 = vmul.f32 %v372_v20, %v275_v30  ;;  %v288_v50 = vsel %vm287_vm6, %v285_v42, %v282_v41 }
  0x20   :  { %v313_v56 = vmul.f32 0.0, %v288_v50 }
  0x22   :  { %v376_v39 = vpop.eup %375 }
  0x23   :  { %v378_v43 = vpop.eup %377  ;;  %v264_v45 = vmul.f32 0.6931472, %v376_v39 }
  0x24   :  { %v273_v46 = vmul.f32 0.6931472, %v378_v43 }
  0x25   :  { %v270_v47 = vsel %vm269_vm4, %v267_v38, %v264_v45 }
  0x26   :  { %v279_v48 = vsel %vm278_vm5, %v276_v40, %v273_v46  ;;  %v298_v49 = vadd.f32 %v270_v47, %v242_v37 }
  0x27   :  { %v299_v51 = vadd.f32 %v279_v48, %v243_v44 }
  0x28   :  { %v311_v52 = vmul.f32 %v357_v6, %v298_v49  ;;  %v320_v53 = vmul.f32 %v359_v12, %v298_v49 }
  0x29   :  { %v312_v54 = vmul.f32 %v358_v7, %v299_v51  ;;  %v321_v55 = vmul.f32 %v360_v13, %v299_v51 }
  0x2b   :  { %v315_v57 = vadd.f32 %v312_v54, %v311_v52  ;;  %v324_v58 = vadd.f32 %v321_v55, %v320_v53 }
  0x2d   :  { %v316_v59 = vadd.f32 %v315_v57, %v313_v56  ;;  %v325_v60 = vadd.f32 %v324_v58, %v313_v56 }
  0x2f   :  { %v317_v61 = vadd.f32 %v316_v59, %v313_v56  ;;  %v326_v62 = vadd.f32 %v325_v60, %v313_v56 }
  0x31   :  { %319 = vst [vmem:[#allocation7 + $0x10] sm:$0xff] %v317_v61 }
  0x32   :  { %328 = vst [vmem:[#allocation7 + $0x18] sm:$0xff] %v326_v62 }
  0x33   :  { %341 = dma.vmem_to_hbm [thread:$0]  %s334_s1, 512, %s336_s23, [#allocation4], %s458_s17, %s458_s17, %s459_s18  }
  0x34   :  { %455 = dma.done.wait [#allocation4], 512  }
  0x35   :  { %456 = vsyncadd [#allocation4], 4294966784 }
  0x36   :  { %346 = vsyncpa [#allocation3], 1 }
  0x37   :  { %347 = vsyncpa [#allocation6], 1 }
  0x38   :  { %348 = vsyncpa [#allocation4], 1 }

</bundles_post_ra>
